<compile_context>
chip_gen: v7x
topology: tpu7x:2x2x1
jax: 0.10.0
libtpu: 0.0.40
codegen_flags: <defaults>
</compile_context>

<pallas_src>
import functools

import jax
import jax.numpy as jnp
from jax.experimental import pallas as pl
from jax.experimental.pallas import tpu as pltpu


def _shift_lanes(a, off):
    """out[:, i] = a[:, (i + off) % HW]  (circular; wrapped cols get masked)."""
    hw = a.shape[-1]
    k = off % hw
    if k == 0:
        return a
    return jnp.concatenate([a[:, k:], a[:, :k]], axis=-1)


def _conv3x3_relu_kernel(x_ref, w_ref, b_ref, m_ref, o_ref, *, H, W, Cout):
    # x_ref : (1, Cin, H*W)     one image, channels on sublanes, pixels on lanes
    # w_ref : (9*Cout, Cin)     packed taps (row t*Cout+co = tap t, out-ch co), *stride
    # b_ref : (Cout, 1)         bias * stride
    # m_ref : (9, H*W)          per-tap validity masks (0/1) over output pixels
    # o_ref : (1, Cout, H*W)    lane-dense output
    HW = H * W
    x = x_ref[0]                                           # (Cin, HW)

    # One MXU matmul for all 9 taps of all output channels.
    p = jnp.dot(w_ref[...], x, preferred_element_type=jnp.float32)   # (9*Cout, HW)

    acc = None
    for dy in range(3):
        for dx in range(3):
            t = dy * 3 + dx
            off = (dy - 1) * W + (dx - 1)
            tap = p[t * Cout:(t + 1) * Cout, :]            # (Cout, HW)
            tap = _shift_lanes(tap, off)                   # out[i] = tap[i+off]
            term = tap * m_ref[t:t + 1, :]                 # zero the padded taps
            acc = term if acc is None else acc + term

    acc = acc + b_ref[...]                                 # (Cout,1) lane-broadcast
    o_ref[0] = jnp.maximum(acc, 0.0).astype(o_ref.dtype)   # relu (stride pre-folded)


def reg_pred_head_forward(x_nchw, weight_oihw, bias, stride=16):
    """x_nchw: (N, Cin, H, W) f32; weight_oihw: (Cout, Cin, 3, 3); bias: (Cout,).

    Returns relu(conv3x3_p1(x) + b) * stride as (N, Cout, H, W).
    """
    assert stride > 0, "stride is folded into weights/bias; requires stride > 0"
    N, Cin, H, W = x_nchw.shape
    Cout = weight_oihw.shape[0]
    HW = H * W
    s = float(stride)

    # Free reshape only -- no transpose / pad passes over the feature map.
    x3 = x_nchw.reshape(N, Cin, HW)

    # Pack weights: (Cout, Cin, ky, kx) -> (9*Cout, Cin), row (ky*3+kx)*Cout+co.
    # Fold the post-relu scale into weights & bias (relu(y)*s == relu(y*s)).
    w_packed = (jnp.transpose(weight_oihw, (2, 3, 0, 1)).reshape(9 * Cout, Cin) * s)
    b_packed = (bias * s).reshape(Cout, 1)

    # Per-tap validity masks over flattened output pixels (tiny constant, 9*HW).
    hh = jnp.arange(H, dtype=jnp.int32)[:, None]
    ww = jnp.arange(W, dtype=jnp.int32)[None, :]
    masks = []
    for dy in range(3):
        for dx in range(3):
            mr = (hh + dy - 1 >= 0) & (hh + dy - 1 < H)
            mc = (ww + dx - 1 >= 0) & (ww + dx - 1 < W)
            masks.append((mr & mc).astype(x_nchw.dtype).reshape(HW))
    mask_arr = jnp.stack(masks, axis=0)                    # (9, HW)

    kernel = functools.partial(_conv3x3_relu_kernel, H=H, W=W, Cout=Cout)

    out3 = pl.pallas_call(
        kernel,
        out_shape=jax.ShapeDtypeStruct((N, Cout, HW), x_nchw.dtype),
        grid_spec=pltpu.PrefetchScalarGridSpec(
            num_scalar_prefetch=0,
            grid=(N,),
            in_specs=[
                pl.BlockSpec((1, Cin, HW), lambda n: (n, 0, 0)),
                pl.BlockSpec((9 * Cout, Cin), lambda n: (0, 0)),
                pl.BlockSpec((Cout, 1), lambda n: (0, 0)),
                pl.BlockSpec((9, HW), lambda n: (0, 0)),
            ],
            out_specs=pl.BlockSpec((1, Cout, HW), lambda n: (n, 0, 0)),
        ),
        compiler_params=pltpu.CompilerParams(
            dimension_semantics=("parallel",),   # shards the batch over v7x's 2 TCs
        ),
    )(x3, w_packed, b_packed, mask_arr)

    return out3.reshape(N, Cout, H, W)           # free reshape (already NCHW order)


def _reference(x_nchw, weight_oihw, bias, stride):
    # Pure-JAX reference (XLA conv) for sanity checking.
    y = jax.lax.conv_general_dilated(
        x_nchw, weight_oihw,
        window_strides=(1, 1), padding=((1, 1), (1, 1)),
        dimension_numbers=("NCHW", "OIHW", "NCHW"),
    )
    y = y + bias.reshape(1, -1, 1, 1)
    return jnp.maximum(y, 0.0) * stride


if __name__ == "__main__":
    # Small shapes consistent with the module (inchannels scaled down for test).
    N, Cin, H, W = 2, 32, 16, 16
    Cout, STRIDE = 4, 16

    key = jax.random.PRNGKey(0)
    kx, kw, kb = jax.random.split(key, 3)
    x = jax.random.normal(kx, (N, Cin, H, W), dtype=jnp.float32)
    # Conv2d weight in PyTorch layout (Cout, Cin, 3, 3).
    weight_oihw = jax.random.normal(kw, (Cout, Cin, 3, 3), dtype=jnp.float32) * 0.05
    bias = jax.random.normal(kb, (Cout,), dtype=jnp.float32) * 0.05

    out = jax.block_until_ready(
        reg_pred_head_forward(x, weight_oihw, bias, stride=STRIDE))
    ref = jax.block_until_ready(_reference(x, weight_oihw, bias, STRIDE))

    assert out.shape == (N, Cout, H, W)
    assert jnp.allclose(out, ref, atol=1e-4, rtol=1e-4), "mismatch vs reference"

    print("KERNEL_OK")
</pallas_src>

<mosaic_0001>
module attributes {stable_mosaic.version = 11 : i64} {
  func.func @_conv3x3_relu_kernel(%arg0: i32, %arg1: memref<1x32x256xf32, #tpu.memory_space<vmem>>, %arg2: memref<36x32xf32, #tpu.memory_space<vmem>>, %arg3: memref<4x1xf32, #tpu.memory_space<vmem>>, %arg4: memref<9x256xf32, #tpu.memory_space<vmem>>, %arg5: memref<1x4x256xf32, #tpu.memory_space<vmem>>) attributes {dimension_semantics = [#tpu.dimension_semantics<parallel>], iteration_bounds = array<i64: 2>, scalar_prefetch = 0 : i64, scratch_operands = 0 : i64, tpu.core_type = #tpu.core_type<tc>, window_params = [{transform_indices = @transform_0, window_bounds = array<i64: 1, 32, 256>}, {pipeline_mode = #tpu.pipeline_mode<synchronous>, transform_indices = @transform_1, window_bounds = array<i64: 36, 32>}, {pipeline_mode = #tpu.pipeline_mode<synchronous>, transform_indices = @transform_2, window_bounds = array<i64: 4, 1>}, {pipeline_mode = #tpu.pipeline_mode<synchronous>, transform_indices = @transform_3, window_bounds = array<i64: 9, 256>}, {transform_indices = @transform_4, window_bounds = array<i64: 1, 4, 256>}]} {
    %c0 = arith.constant 0 : index
    %c0_0 = arith.constant 0 : index
    %c0_1 = arith.constant 0 : index
    %0 = vector.load %arg1[%c0, %c0_0, %c0_1] : memref<1x32x256xf32, #tpu.memory_space<vmem>>, vector<1x32x256xf32>
    %1 = vector.shape_cast %0 : vector<1x32x256xf32> to vector<32x256xf32>
    %c0_2 = arith.constant 0 : index
    %c0_3 = arith.constant 0 : index
    %2 = vector.load %arg2[%c0_2, %c0_3] : memref<36x32xf32, #tpu.memory_space<vmem>>, vector<36x32xf32>
    %cst = arith.constant dense<0.000000e+00> : vector<36x256xf32>
    %3 = tpu.matmul %2, %1, %cst {dimension_numbers = #tpu.dot_dimension_numbers<[1], [0], [0], [1], [0, 0, 1, 1], [], []>} : vector<36x32xf32>, vector<32x256xf32>, vector<36x256xf32> -> vector<36x256xf32>
    %4 = vector.extract_strided_slice %3 {offsets = [0, 0], sizes = [4, 256], strides = [1, 1]} : vector<36x256xf32> to vector<4x256xf32>
    %5 = vector.extract_strided_slice %4 {offsets = [0, 239], sizes = [4, 17], strides = [1, 1]} : vector<4x256xf32> to vector<4x17xf32>
    %6 = vector.extract_strided_slice %4 {offsets = [0, 0], sizes = [4, 239], strides = [1, 1]} : vector<4x256xf32> to vector<4x239xf32>
    %7 = tpu.concatenate %5, %6 in 1 : vector<4x17xf32>, vector<4x239xf32> -> vector<4x256xf32>
    %c0_4 = arith.constant 0 : index
    %c0_5 = arith.constant 0 : index
    %8 = vector.load %arg4[%c0_4, %c0_5] : memref<9x256xf32, #tpu.memory_space<vmem>>, vector<1x256xf32>
    %9 = vector.broadcast %8 : vector<1x256xf32> to vector<4x256xf32>
    %10 = arith.mulf %7, %9 : vector<4x256xf32>
    %11 = vector.extract_strided_slice %3 {offsets = [4, 0], sizes = [4, 256], strides = [1, 1]} : vector<36x256xf32> to vector<4x256xf32>
    %12 = vector.extract_strided_slice %11 {offsets = [0, 240], sizes = [4, 16], strides = [1, 1]} : vector<4x256xf32> to vector<4x16xf32>
    %13 = vector.extract_strided_slice %11 {offsets = [0, 0], sizes = [4, 240], strides = [1, 1]} : vector<4x256xf32> to vector<4x240xf32>
    %14 = tpu.concatenate %12, %13 in 1 : vector<4x16xf32>, vector<4x240xf32> -> vector<4x256xf32>
    %c1 = arith.constant 1 : index
    %c0_6 = arith.constant 0 : index
    %15 = vector.load %arg4[%c1, %c0_6] : memref<9x256xf32, #tpu.memory_space<vmem>>, vector<1x256xf32>
    %16 = vector.broadcast %15 : vector<1x256xf32> to vector<4x256xf32>
    %17 = arith.mulf %14, %16 : vector<4x256xf32>
    %18 = arith.addf %10, %17 : vector<4x256xf32>
    %19 = vector.extract_strided_slice %3 {offsets = [8, 0], sizes = [4, 256], strides = [1, 1]} : vector<36x256xf32> to vector<4x256xf32>
    %20 = vector.extract_strided_slice %19 {offsets = [0, 241], sizes = [4, 15], strides = [1, 1]} : vector<4x256xf32> to vector<4x15xf32>
    %21 = vector.extract_strided_slice %19 {offsets = [0, 0], sizes = [4, 241], strides = [1, 1]} : vector<4x256xf32> to vector<4x241xf32>
    %22 = tpu.concatenate %20, %21 in 1 : vector<4x15xf32>, vector<4x241xf32> -> vector<4x256xf32>
    %c2 = arith.constant 2 : index
    %c0_7 = arith.constant 0 : index
    %23 = vector.load %arg4[%c2, %c0_7] : memref<9x256xf32, #tpu.memory_space<vmem>>, vector<1x256xf32>
    %24 = vector.broadcast %23 : vector<1x256xf32> to vector<4x256xf32>
    %25 = arith.mulf %22, %24 : vector<4x256xf32>
    %26 = arith.addf %18, %25 : vector<4x256xf32>
    %27 = vector.extract_strided_slice %3 {offsets = [12, 0], sizes = [4, 256], strides = [1, 1]} : vector<36x256xf32> to vector<4x256xf32>
    %28 = vector.extract_strided_slice %27 {offsets = [0, 255], sizes = [4, 1], strides = [1, 1]} : vector<4x256xf32> to vector<4x1xf32>
    %29 = vector.extract_strided_slice %27 {offsets = [0, 0], sizes = [4, 255], strides = [1, 1]} : vector<4x256xf32> to vector<4x255xf32>
    %30 = tpu.concatenate %28, %29 in 1 : vector<4x1xf32>, vector<4x255xf32> -> vector<4x256xf32>
    %c3 = arith.constant 3 : index
    %c0_8 = arith.constant 0 : index
    %31 = vector.load %arg4[%c3, %c0_8] : memref<9x256xf32, #tpu.memory_space<vmem>>, vector<1x256xf32>
    %32 = vector.broadcast %31 : vector<1x256xf32> to vector<4x256xf32>
    %33 = arith.mulf %30, %32 : vector<4x256xf32>
    %34 = arith.addf %26, %33 : vector<4x256xf32>
    %35 = vector.extract_strided_slice %3 {offsets = [16, 0], sizes = [4, 256], strides = [1, 1]} : vector<36x256xf32> to vector<4x256xf32>
    %c4 = arith.constant 4 : index
    %c0_9 = arith.constant 0 : index
    %36 = vector.load %arg4[%c4, %c0_9] : memref<9x256xf32, #tpu.memory_space<vmem>>, vector<1x256xf32>
    %37 = vector.broadcast %36 : vector<1x256xf32> to vector<4x256xf32>
    %38 = arith.mulf %35, %37 : vector<4x256xf32>
    %39 = arith.addf %34, %38 : vector<4x256xf32>
    %40 = vector.extract_strided_slice %3 {offsets = [20, 0], sizes = [4, 256], strides = [1, 1]} : vector<36x256xf32> to vector<4x256xf32>
    %41 = vector.extract_strided_slice %40 {offsets = [0, 1], sizes = [4, 255], strides = [1, 1]} : vector<4x256xf32> to vector<4x255xf32>
    %42 = vector.extract_strided_slice %40 {offsets = [0, 0], sizes = [4, 1], strides = [1, 1]} : vector<4x256xf32> to vector<4x1xf32>
    %43 = tpu.concatenate %41, %42 in 1 : vector<4x255xf32>, vector<4x1xf32> -> vector<4x256xf32>
    %c5 = arith.constant 5 : index
    %c0_10 = arith.constant 0 : index
    %44 = vector.load %arg4[%c5, %c0_10] : memref<9x256xf32, #tpu.memory_space<vmem>>, vector<1x256xf32>
    %45 = vector.broadcast %44 : vector<1x256xf32> to vector<4x256xf32>
    %46 = arith.mulf %43, %45 : vector<4x256xf32>
    %47 = arith.addf %39, %46 : vector<4x256xf32>
    %48 = vector.extract_strided_slice %3 {offsets = [24, 0], sizes = [4, 256], strides = [1, 1]} : vector<36x256xf32> to vector<4x256xf32>
    %49 = vector.extract_strided_slice %48 {offsets = [0, 15], sizes = [4, 241], strides = [1, 1]} : vector<4x256xf32> to vector<4x241xf32>
    %50 = vector.extract_strided_slice %48 {offsets = [0, 0], sizes = [4, 15], strides = [1, 1]} : vector<4x256xf32> to vector<4x15xf32>
    %51 = tpu.concatenate %49, %50 in 1 : vector<4x241xf32>, vector<4x15xf32> -> vector<4x256xf32>
    %c6 = arith.constant 6 : index
    %c0_11 = arith.constant 0 : index
    %52 = vector.load %arg4[%c6, %c0_11] : memref<9x256xf32, #tpu.memory_space<vmem>>, vector<1x256xf32>
    %53 = vector.broadcast %52 : vector<1x256xf32> to vector<4x256xf32>
    %54 = arith.mulf %51, %53 : vector<4x256xf32>
    %55 = arith.addf %47, %54 : vector<4x256xf32>
    %56 = vector.extract_strided_slice %3 {offsets = [28, 0], sizes = [4, 256], strides = [1, 1]} : vector<36x256xf32> to vector<4x256xf32>
    %57 = vector.extract_strided_slice %56 {offsets = [0, 16], sizes = [4, 240], strides = [1, 1]} : vector<4x256xf32> to vector<4x240xf32>
    %58 = vector.extract_strided_slice %56 {offsets = [0, 0], sizes = [4, 16], strides = [1, 1]} : vector<4x256xf32> to vector<4x16xf32>
    %59 = tpu.concatenate %57, %58 in 1 : vector<4x240xf32>, vector<4x16xf32> -> vector<4x256xf32>
    %c7 = arith.constant 7 : index
    %c0_12 = arith.constant 0 : index
    %60 = vector.load %arg4[%c7, %c0_12] : memref<9x256xf32, #tpu.memory_space<vmem>>, vector<1x256xf32>
    %61 = vector.broadcast %60 : vector<1x256xf32> to vector<4x256xf32>
    %62 = arith.mulf %59, %61 : vector<4x256xf32>
    %63 = arith.addf %55, %62 : vector<4x256xf32>
    %64 = vector.extract_strided_slice %3 {offsets = [32, 0], sizes = [4, 256], strides = [1, 1]} : vector<36x256xf32> to vector<4x256xf32>
    %65 = vector.extract_strided_slice %64 {offsets = [0, 17], sizes = [4, 239], strides = [1, 1]} : vector<4x256xf32> to vector<4x239xf32>
    %66 = vector.extract_strided_slice %64 {offsets = [0, 0], sizes = [4, 17], strides = [1, 1]} : vector<4x256xf32> to vector<4x17xf32>
    %67 = tpu.concatenate %65, %66 in 1 : vector<4x239xf32>, vector<4x17xf32> -> vector<4x256xf32>
    %c8 = arith.constant 8 : index
    %c0_13 = arith.constant 0 : index
    %68 = vector.load %arg4[%c8, %c0_13] : memref<9x256xf32, #tpu.memory_space<vmem>>, vector<1x256xf32>
    %69 = vector.broadcast %68 : vector<1x256xf32> to vector<4x256xf32>
    %70 = arith.mulf %67, %69 : vector<4x256xf32>
    %71 = arith.addf %63, %70 : vector<4x256xf32>
    %c0_14 = arith.constant 0 : index
    %c0_15 = arith.constant 0 : index
    %72 = vector.load %arg3[%c0_14, %c0_15] : memref<4x1xf32, #tpu.memory_space<vmem>>, vector<4x1xf32>
    %73 = vector.broadcast %72 : vector<4x1xf32> to vector<4x256xf32>
    %74 = arith.addf %71, %73 : vector<4x256xf32>
    %cst_16 = arith.constant 0.000000e+00 : f32
    %75 = vector.broadcast %cst_16 : f32 to vector<4x256xf32>
    %76 = arith.maximumf %74, %75 : vector<4x256xf32>
    %c0_17 = arith.constant 0 : index
    %c0_18 = arith.constant 0 : index
    %c0_19 = arith.constant 0 : index
    %77 = vector.load %arg5[%c0_17, %c0_18, %c0_19] : memref<1x4x256xf32, #tpu.memory_space<vmem>>, vector<1x4x256xf32>
    %78 = vector.shape_cast %77 : vector<1x4x256xf32> to vector<4x256xf32>
    %79 = vector.shape_cast %76 : vector<4x256xf32> to vector<1x4x256xf32>
    tpu.vector_store %arg5[%c0_17, %c0_18, %c0_19], %79 {strides = array<i32>} : memref<1x4x256xf32, #tpu.memory_space<vmem>>, vector<1x4x256xf32>,
    return
  }
  func.func @transform_0(%arg0: i32) -> (i32, i32, i32) {
    %c0_i32 = arith.constant 0 : i32
    %c0_i32_0 = arith.constant 0 : i32
    %c0_i32_1 = arith.constant 0 : i32
    return %arg0, %c0_i32, %c0_i32_0 : i32, i32, i32
  }
  func.func @transform_1(%arg0: i32) -> (i32, i32) {
    %c0_i32 = arith.constant 0 : i32
    %c0_i32_0 = arith.constant 0 : i32
    %c0_i32_1 = arith.constant 0 : i32
    return %c0_i32, %c0_i32_0 : i32, i32
  }
  func.func @transform_2(%arg0: i32) -> (i32, i32) {
    %c0_i32 = arith.constant 0 : i32
    %c0_i32_0 = arith.constant 0 : i32
    %c0_i32_1 = arith.constant 0 : i32
    return %c0_i32, %c0_i32_0 : i32, i32
  }
  func.func @transform_3(%arg0: i32) -> (i32, i32) {
    %c0_i32 = arith.constant 0 : i32
    %c0_i32_0 = arith.constant 0 : i32
    %c0_i32_1 = arith.constant 0 : i32
    return %c0_i32, %c0_i32_0 : i32, i32
  }
  func.func @transform_4(%arg0: i32) -> (i32, i32, i32) {
    %c0_i32 = arith.constant 0 : i32
    %c0_i32_0 = arith.constant 0 : i32
    %c0_i32_1 = arith.constant 0 : i32
    return %arg0, %c0_i32, %c0_i32_0 : i32, i32, i32
  }
}

</mosaic_0001>

<bundles_post_ra>
// kernel: tpu_custom_call.1
= control target key start
LH: loop header
LB: loop body
LE: loop exit
PB: predicated region body
PF: predicated region fallthrough
CT: control target
= control target key end

     0   :  { %9 = vsyncpa [#allocation3], 0  ;;  %s1187_s0 = inlined_call_operand.hbm [shape: f32[2,32,256], index: 0, kind: input, shape index: {}]   ;;  %s1188_s1 = inlined_call_operand.vmem [shape: f32[36,32], index: 1, kind: input, shape index: {}]   ;;  %s1189_s2 = inlined_call_operand.vmem [shape: f32[4,1], index: 2, kind: input, shape index: {}]   ;;  %s1190_s3 = inlined_call_operand.vmem [shape: f32[9,256], index: 3, kind: input, shape index: {}]   ;;  %s1191_s4 = inlined_call_operand.hbm [shape: f32[2,4,256], index: 4, kind: output, shape index: {}]  }
   0x1   :  { %11 = vsyncpa [#allocation3 + $0x1], 0 }
   0x2   :  { %12 = vsyncpa [#allocation4], 0 }
   0x3   :  { %14 = vsyncpa [#allocation4 + $0x1], 0  ;;  %s941_s15 = smov 0   ;;  %s943_s16 = smov 0  }
   0x4   :  { %s945_s17 = smov 0   ;;  %s947_s18 = smov 0  }
   0x5 LB: > { %s962_s19 = sadd.s32 4294967295, %s900_s18   ;;  %s704_s20 = sadd.s32 4294967294, %s900_s18   ;;  %s900_s18 = sphi %s947_s18, %s1204_s18   ;;  %s896_s17 = sphi %s945_s17, %s1203_s17   ;;  %s892_s16 = sphi %s943_s16, %s1202_s16   ;;  %s888_s15 = sphi %s941_s15, %s1201_s15  }
   0x6   : > { %s966_s21 = sadd.s32 1, %s900_s18   ;;  %s27_s22 = sadd.s32 1, %s896_s17 }
   0x7   : > { %s24_s23 = ssub.s32 %s900_s18, %s966_s21  ;;  %p34_p0 = scmp.ne.s32.totalorder %s896_s17, %s892_s16 }
   0x8   : > { %p25_p1 = scmp.eq.s32.totalorder %s24_s23, 0  ;;  %p35_p2 = scmp.eq.s32.totalorder %s900_s18, 0 }
   0x9   : > { %p40_p3 = scmp.ne.s32.totalorder %s892_s16, %s888_s15  ;;  %p41_p4 = scmp.eq.s32.totalorder %s962_s19, 0 }
   0xa   : > { %s978_s24 = scalar_select %p25_p1, %s896_s17, %s27_s22  }
   0xb   : > { %p980_p5 = por %p35_p2, %p34_p0  ;;  %p984_p6 = por %p41_p4, %p40_p3 }
   0xc   : > { %p127_p7 = scmp.eq.s32.totalorder %s962_s19, 1  ;;  %p133_p8 = scmp.eq.s32.totalorder %s704_s20, 1 }
   0xd   : > { %p757_p10 = scmp.lt.s32.totalorder %s900_s18, 2  ;;  %s162_s29 = sand.u32 1, %s896_s17  }
   0xe   : > { %p991_p11 = por %p127_p7, %p34_p0  ;;  %p995_p12 = por %p133_p8, %p40_p3 }
   0xf   : > { %s731_s30 = sshll.u32 %s900_s18, 10  ;;  %s707_s5 = sshll.u32 %s162_s29, 6 }
  0x10   : > { %s1195_s27 = scalar_select %p991_p11, 1, 0 }
  0x11   : > { %s1196_s28 = scalar_select %p995_p12, 1, 0 }
  0x12   : > { %s1004_s8 = scalar_lea.hbm %s1187_s0, %s731_s30  ;;  %s166_s9 = scalar_lea.vmem [#allocation2], %s707_s5 }
  0x13   : > { %s173_s10 = sshll.u32 %s166_s9, 4  ;;  %p1008_p13 = pnand %p757_p10, %p980_p5  ;;  %s1012_s10 = int_to_ptr.vmem [resolvable:$true] %s173_s10 }
  0x14   : > { %s1014_s12 = scalar_lea.sflag [#allocation3], %s162_s29  ;;  %s804_s13 = scalar_lea.hbm %s1004_s8, 1024 }
  0x15   : > { %p805_p0 = scmp.ne.s32.totalorder %s1004_s8, %s804_s13  ;;  %p806_p1 = pneg %p1008_p13 }
  0x16   : > { %s809_s22 = scalar_lea.hbm %s1187_s0, 2048  ;;  %p810_p4 = scmp.lt.u32.totalorder %s1004_s8, %s1187_s0 }
  0x17   : > { %p807_p2 = pnand %p806_p1, %p805_p0  ;;  %p811_p5 = scmp.lt.u32.totalorder %s809_s22, %s804_s13 }
  0x18   : > { %p813_p8 = scmp.lt.u32.totalorder %s804_s13, %s1004_s8 }
  0x19   : > { %p808_p3 = pneg %p807_p2  ;;  %p812_p7 = por %p811_p5, %p810_p4 }
  0x1b   : > { %p814_p10 = por %p813_p8, %p812_p7 }
  0x1d   : > { %p815_p9 = pnand %p814_p10, %p808_p3 }
  0x1f   : > { %818 = shalt.err (!%p815_p9)
}
  0x20   : > { %s819_s29 = scalar_lea.vmem %s1012_s10, 1024  ;;  %s902_s30 = smov [#allocation2]  }
  0x21   : > { %p820_p0 = scmp.ne.s32.totalorder %s1012_s10, %s819_s29  ;;  %s824_s5 = sshll.u32 %s902_s30, 4  ;;  %s825_s5 = int_to_ptr.vmem [resolvable:$false] %s824_s5 }
  0x22   : > { %s826_s6 = scalar_lea.vmem %s825_s5, 2048  ;;  %p827_p11 = scmp.lt.s32.totalorder %s1012_s10, %s825_s5 }
  0x23   : > { %p822_p2 = pnand %p820_p0, %p806_p1  ;;  %p828_p4 = scmp.lt.s32.totalorder %s826_s6, %s819_s29 }
  0x25   : > { %p823_p12 = pneg %p822_p2  ;;  %p829_p5 = por %p828_p4, %p827_p11 }
  0x27   : > { %p830_p7 = pnand %p829_p5, %p823_p12 }
  0x29   : > { %833 = shalt.err (!%p830_p7)
}
  0x2a   : > { %s903_s7 = smov 256   ;;  %s904_s9 = smov 16  }
  0x2b   : > { %752 = dma.hbm_to_vmem [thread:$0]  (!%p1008_p13), %s1004_s8, 1024, %s1012_s10, %s1014_s12, %s903_s7, %s903_s7, %s904_s9  }
  0x2c   : > { %p710_p9 = scmp.ge.s32.totalorder %s900_s18, 1  ;;  %p181_p1 = scmp.lt.s32.totalorder %s900_s18, 3 }
  0x2e   : > { %p182_p3 = pnand %p710_p9, %p181_p1 }
  0x2f   : > { %s1045_s13 = sand.u32 (!%p182_p3), 1, %s892_s16  }
  0x30   : > { %185 = sbr.rel (%p182_p3) target bundleno = 455 (0x1c7), region = 36  ;;  %s711_s14 = sshll.u32 (!%p182_p3), %s1045_s13, 6 }
  0x31   : > { %s188_s20 = scalar_lea.sflag (!%p182_p3), [#allocation3], %s1045_s13  ;;  %s191_s22 = scalar_lea.vmem (!%p182_p3), [#allocation2], %s711_s14 }
  0x37   : > { %879 = dma.done.wait (%p984_p6), %s188_s20, 1024  }
  0x38   : > { %881 = vsyncadd (%p984_p6), %s188_s20, 4294966272  ;;  %v905_v0 = vmov 0.0   ;;  %v217_v1 = vld [vmem:[%s191_s22 + $0x8] sm:$0xff]  ;;  %v219_v2 = vld [vmem:[%s191_s22 + $0x18] sm:$0xff]  ;;  %vm229_vm0 = vcmask 261120   ;;  %v906_v18 = vmov 0   ;;  %v354_v30 = vlaneseq }
  0x39   : > { %309 = vmatprep.mubr.f32.mxu0 %v905_v0  ;;  %327 = vmatprep.mubr.f32.mxu1 %v905_v0  ;;  %v216_v3 = vld [vmem:[%s191_s22] sm:$0xff]  ;;  %v733_v4 = vpack.c.bf16 %v219_v2, %v217_v1  ;;  %v218_v5 = vld [vmem:[%s191_s22 + $0x10] sm:$0xff]  ;;  %v221_v6 = vld [vmem:[%s191_s22 + $0x28] sm:$0xff]  ;;  %s907_s6 = smov 17   ;;  %s908_s7 = smov 16   ;;  %vm371_vm1 = vcmask 130048  }
  0x3a   : > { %v223_v7 = vld [vmem:[%s191_s22 + $0x38] sm:$0xff]  ;;  %v735_v8 = vpack.c.bf16 %v218_v5, %v216_v3  ;;  %v220_v10 = vld [vmem:[%s191_s22 + $0x20] sm:$0xff]  ;;  %v222_v11 = vld [vmem:[%s191_s22 + $0x30] sm:$0xff]  ;;  %803 = vset.pattern.permute.xlu0 %v906_v18  ;;  %s909_s9 = smov 113   ;;  %s910_s14 = smov 15   ;;  %v355_v31 = vshrl.u32 %v354_v30, 7 }
  0x3b   : > { %v737_v9 = vpack.c.bf16 %v223_v7, %v221_v6  ;;  %734 = vmatprep.subr.bf16.mxu0 %v733_v4  ;;  %741 = vmatprep.subr.bf16.mxu1 %v733_v4  ;;  %v739_v12 = vpack.c.bf16 %v222_v11, %v220_v10  ;;  %v224_v13 = vld [vmem:[%s1188_s1] sm:$0xff]  ;;  %v227_v14 = vld [vmem:[%s1188_s1 + $0x18] sm:$0xff]  ;;  %v225_v15 = vld [vmem:[%s1188_s1 + $0x8] sm:$0xff]  ;;  %s911_s20 = smov 1   ;;  %s912_s22 = smov 112   ;;  %vm347_vm2 = vcmask 138240  }
  0x3c   : > { %736 = vmatpush1.bf16.msra.mxu0 %v735_v8  ;;  %743 = vmatpush1.bf16.msra.mxu1 %v735_v8  ;;  %v228_v16 = vld [vmem:[%s1188_s1 + $0x20] sm:$0xf]  ;;  %v226_v17 = vld [vmem:[%s1188_s1 + $0x10] sm:$0xff]  ;;  %s913_s26 = smov 127   ;;  %s914_s11 = smov 111   ;;  %v1080_v35 = vsub.s32 0, %v355_v31 }
  0x3d   : > { %738 = vmatprep.subr.bf16.mxu0 %v737_v9  ;;  %742 = vmatprep.subr.bf16.mxu1 %v737_v9  ;;  %v604_v29 = vld [vmem:[%s1189_s2] sm:$0xf]  ;;  %v1082_v36 = vsub.s32 1, %v355_v31  ;;  %vm406_vm3 = vcmask 121856   ;;  %vm433_vm4 = vcmask 7168   ;;  %vm484_vm5 = vcmask 1039360  }
  0x3e   : > { %v718_v34 = vld [vmem:[%s1190_s3 + $0x1] ss:$8 sm:$0x3]  ;;  %v352_v41 = vld [vmem:[%s1190_s3] ss:$8 sm:$0x3] }
  0x3f   : > { %v382_v39 = vrot.slane %v718_v34, %v1080_v35  ;;  %v386_v40 = vrot.slane %v718_v34, %v1082_v36  ;;  %v719_v48 = vld [vmem:[%s1190_s3 + $0x2] ss:$8 sm:$0x3]  ;;  %v357_v49 = vrot.slane %v352_v41, %v1080_v35  ;;  %v361_v50 = vrot.slane %v352_v41, %v1082_v36  ;;  %v720_v51 = vld [vmem:[%s1190_s3 + $0x3] ss:$8 sm:$0x3] }
  0x40   : > { %740 = vmatpush1.bf16.msra.mxu0 %v739_v12  ;;  %744 = vmatpush1.bf16.msra.mxu1 %v739_v12  ;;  %v417_v58 = vrot.slane %v719_v48, %v1080_v35  ;;  %v421_v59 = vrot.slane %v719_v48, %v1082_v36  ;;  %v444_v60 = vrot.slane %v720_v51, %v1080_v35  ;;  %v721_v2 = vld [vmem:[%s1190_s3 + $0x4] ss:$8 sm:$0x3]  ;;  %vm519_vm6 = vcmask 924672   ;;  %s712_s25 = sshll.u32 %s1045_s13, 3  ;;  %s732_s29 = sshll.u32 %s962_s19, 7 }
  0x41   : > { %v448_v61 = vrot.slane %v720_v51, %v1082_v36  ;;  %vm546_vm7 = vcmask 916480   ;;  %vm581_vm8 = vcmask 908288   ;;  %s215_s30 = scalar_lea.vmem [#allocation5], %s712_s25  ;;  %p1198_p11 = scmp.ne.s32.totalorder %s1195_s27, 0 }
  0x42   : > { %s634_s5 = sshll.u32 %s215_s30, 4  ;;  %s915_s19 = smov [#allocation5]   ;;  %s1145_s5 = int_to_ptr.vmem [resolvable:$true] %s634_s5 }
  0x43   : > { %713 = vmatmul.mubr.msk.f32.vlgmr.msra.gmra.mrb[0].mxu0 %vm229_vm0, %v224_v13  ;;  %716 = vmatmul.mubr.msk.f32.vlgmr.msra.gmra.mrb[0].mxu1 %vm229_vm0, %v227_v14  ;;  %v467_v13 = vrot.slane %v721_v2, %v1080_v35  ;;  %v722_v14 = vld [vmem:[%s1190_s3 + $0x5] ss:$8 sm:$0x3] }
  0x44   : > { %315 = vmatprep.mubr.f32.mxu0 %v905_v0  ;;  %333 = vmatprep.mubr.f32.mxu1 %v905_v0 }
  0x47   : > { %714 = vmatmul.mubr.msk.f32.gmra.mrb[2].mxu0 %vm229_vm0, %v225_v15  ;;  %717 = vmatmul.mubr.msk.f32.gmra.mrb[2].mxu1 %vm229_vm0, %v228_v16  ;;  %v471_v15 = vrot.slane %v721_v2, %v1082_v36  ;;  %v723_v16 = vld [vmem:[%s1190_s3 + $0x6] ss:$8 sm:$0x3] }
  0x48   : > { %321 = vmatprep.mubr.f32.mxu0 %v905_v0  ;;  %v535_v30 = vrot.slane %v723_v16, %v1082_v36 }
  0x4b   : > { %715 = vmatmul.mubr.msk.f32.gmra.mrb[4].mxu0 %vm229_vm0, %v226_v17 }
 0x116   : > { %v311_v19 = vpop.f32.mrb[0].mxu0  ;;  %v329_v20 = vpop.f32.mrb[0].mxu1 }
 0x117   : > { %345 = vrot.lane.b32.xlu1 %v311_v19, %s907_s6  ;;  %369 = vrot.lane.b32.xlu0 %v311_v19, %s908_s7  ;;  %v313_v21 = vpop.f32.mrb[1].mxu0  ;;  %v331_v22 = vpop.f32.mrb[1].mxu1 }
 0x11a   : > { %v317_v23 = vpop.f32.mrb[2].mxu0  ;;  %v335_v24 = vpop.f32.mrb[2].mxu1 }
 0x11b   : > { %515 = vrot.lane.b32.xlu0 %v329_v20, %s909_s9  ;;  %341 = vrot.lane.b32.xlu1 %v313_v21, %s907_s6  ;;  %v319_v25 = vpop.f32.mrb[3].mxu0  ;;  %v337_v26 = vpop.f32.mrb[3].mxu1 }
 0x11e   : > { %v1068_v27 = vpop.f32.mrb[4].mxu0 }
 0x11f   : > { %517 = vrot.lane.b32.xlu1 %v331_v22, %s909_s9  ;;  %366 = vrot.lane.b32.xlu0 %v313_v21, %s908_s7  ;;  %v1070_v28 = vpop.f32.mrb[5].mxu0  ;;  %s1143_s9 = scalar_lea.hbm %s1191_s4, %s732_s29 }
 0x120   : > { %v475_v31 = vmul.f32 %v471_v15, %v1070_v28 }
 0x123   : > { %404 = vrot.lane.b32.xlu1 %v317_v23, %s910_s14  ;;  %400 = vrot.lane.b32.xlu0 %v319_v25, %s910_s14  ;;  %s620_s14 = scalar_lea.sflag [#allocation4], %s1045_s13 }
 0x127   : > { %431 = vrot.lane.b32.xlu1 %v317_v23, %s911_s20  ;;  %428 = vrot.lane.b32.xlu0 %v319_v25, %s911_s20  ;;  %v724_v23 = vld [vmem:[%s1190_s3 + $0x7] ss:$8 sm:$0x3]  ;;  %v500_v25 = vrot.slane %v722_v14, %v1082_v36  ;;  %s834_s20 = scalar_lea.vmem %s1145_s5, 128 }
 0x128   : > { %p835_p6 = scmp.ne.s32.totalorder %s1145_s5, %s834_s20 }
 0x12a   : > { %p836_p12 = pnand %p835_p6, %p1198_p11 }
 0x12b   : > { %544 = vrot.lane.b32.xlu1 %v331_v22, %s912_s22  ;;  %480 = vrot.lane.b32.xlu0 %v1068_v27, %s913_s26 }
 0x12c   : > { %p837_p13 = pneg %p836_p12 }
 0x12f   : > { %542 = vrot.lane.b32.xlu0 %v329_v20, %s912_s22  ;;  %482 = vrot.lane.b32.xlu1 %v1070_v28, %s913_s26  ;;  %s838_s22 = sshll.u32 %s915_s19, 4  ;;  %s839_s22 = int_to_ptr.vmem [resolvable:$false] %s838_s22 }
 0x130   : > { %s840_s26 = scalar_lea.vmem %s839_s22, 256  ;;  %p841_p8 = scmp.lt.s32.totalorder %s1145_s5, %s839_s22 }
 0x131   : > { %p842_p10 = scmp.lt.s32.totalorder %s840_s26, %s834_s20 }
 0x133   : > { %607 = vperm.xlu0 %803, %v604_v29   ;;  %577 = vrot.lane.b32.xlu1 %v335_v24, %s914_s11  ;;  %v496_v24 = vrot.slane %v722_v14, %v1080_v35  ;;  %v531_v29 = vrot.slane %v723_v16, %v1080_v35  ;;  %p843_p0 = por %p842_p10, %p841_p8 }
 0x135   : > { %p844_p2 = pnand %p843_p0, %p837_p13 }
 0x137   : > { %579 = vrot.lane.b32.xlu1 %v337_v26, %s914_s11  ;;  %v474_v26 = vmul.f32 %v467_v13, %v1068_v27 }
 0x189   : > { %v346_v32 = vpop.permute.xlu1 %345  ;;  %v370_v33 = vpop.permute.xlu0 %369 }
 0x18d   : > { %v1084_v37 = vpop.permute.xlu0 %515  ;;  %v342_v38 = vpop.permute.xlu1 %341 }
 0x18e   : > { %v348_v52 = vsel %vm347_vm2, %v346_v32, %v342_v38  ;;  %v351_v53 = vsel %vm347_vm2, %v342_v38, %v346_v32 }
 0x18f   : > { %v364_v62 = vmul.f32 %v357_v49, %v351_v53  ;;  %v365_v63 = vmul.f32 %v361_v50, %v348_v52 }
 0x191   : > { %v1091_v42 = vpop.permute.xlu1 %517  ;;  %v367_v43 = vpop.permute.xlu0 %366 }
 0x192   : > { %v372_v44 = vsel %vm371_vm1, %v370_v33, %v367_v43  ;;  %v375_v45 = vsel %vm371_vm1, %v367_v43, %v370_v33  ;;  %v520_v43 = vsel %vm519_vm6, %v1084_v37, %v1091_v42 }
 0x193   : > { %v389_v46 = vmul.f32 %v382_v39, %v375_v45  ;;  %v390_v47 = vmul.f32 %v386_v40, %v372_v44  ;;  %v558_v39 = vrot.slane %v724_v23, %v1080_v35  ;;  %v562_v40 = vrot.slane %v724_v23, %v1082_v36 }
 0x194   : > { %v524_v44 = vsel %vm519_vm6, %v1091_v42, %v1084_v37  ;;  %v538_v53 = vmul.f32 %v531_v29, %v520_v43 }
 0x195   : > { %v405_v54 = vpop.permute.xlu1 %404  ;;  %v401_v55 = vpop.permute.xlu0 %400  ;;  %v393_v56 = vrot.slane %v389_v46, 4  ;;  %v394_v57 = vrot.slane %v390_v47, 4 }
 0x196   : > { %v407_v0 = vsel %vm406_vm3, %v405_v54, %v401_v55  ;;  %v410_v1 = vsel %vm406_vm3, %v401_v55, %v405_v54  ;;  %v539_v54 = vmul.f32 %v535_v30, %v524_v44  ;;  %v725_v55 = vld [vmem:[%s1190_s3 + $0x10] ss:$8 sm:$0x3] }
 0x197   : > { %v397_v5 = vadd.f32 %v393_v56, %v364_v62  ;;  %v398_v6 = vadd.f32 %v394_v57, %v365_v63  ;;  %v424_v9 = vmul.f32 %v417_v58, %v410_v1  ;;  %v425_v10 = vmul.f32 %v421_v59, %v407_v0 }
 0x198   : > { %v593_v58 = vrot.slane %v725_v55, %v1080_v35  ;;  %v597_v59 = vrot.slane %v725_v55, %v1082_v36 }
 0x199   : > { %v432_v3 = vpop.permute.xlu1 %431  ;;  %v429_v4 = vpop.permute.xlu0 %428  ;;  %v426_v21 = vadd.f32 %v424_v9, %v397_v5  ;;  %v427_v22 = vadd.f32 %v425_v10, %v398_v6 }
 0x19a   : > { %v434_v7 = vsel %vm433_vm4, %v432_v3, %v429_v4  ;;  %v437_v8 = vsel %vm433_vm4, %v429_v4, %v432_v3 }
 0x19b   : > { %v451_v11 = vmul.f32 %v444_v60, %v437_v8  ;;  %v452_v12 = vmul.f32 %v448_v61, %v434_v7 }
 0x19d   : > { %v455_v17 = vrot.slane %v451_v11, 4  ;;  %v456_v18 = vrot.slane %v452_v12, 4  ;;  %v545_v19 = vpop.permute.xlu1 %544  ;;  %v481_v20 = vpop.permute.xlu0 %480 }
 0x19f   : > { %v459_v32 = vadd.f32 %v455_v17, %v426_v21  ;;  %v460_v33 = vadd.f32 %v456_v18, %v427_v22 }
 0x1a1   : > { %v543_v34 = vpop.permute.xlu0 %542  ;;  %v483_v38 = vpop.permute.xlu1 %482  ;;  %v476_v48 = vadd.f32 %v474_v26, %v459_v32  ;;  %v477_v49 = vadd.f32 %v475_v31, %v460_v33 }
 0x1a2   : > { %v485_v41 = vsel %vm484_vm5, %v481_v20, %v483_v38  ;;  %v489_v27 = vsel %vm484_vm5, %v483_v38, %v481_v20  ;;  %v547_v46 = vsel %vm546_vm7, %v543_v34, %v545_v19  ;;  %v551_v47 = vsel %vm546_vm7, %v545_v19, %v543_v34 }
 0x1a3   : > { %v503_v28 = vmul.f32 %v496_v24, %v485_v41  ;;  %v504_v45 = vmul.f32 %v500_v25, %v489_v27  ;;  %v565_v56 = vmul.f32 %v558_v39, %v547_v46  ;;  %v566_v57 = vmul.f32 %v562_v40, %v551_v47 }
 0x1a5   : > { %v507_v50 = vrot.slane %v503_v28, 4  ;;  %v508_v51 = vrot.slane %v504_v45, 4  ;;  %v578_v52 = vpop.permute.xlu1 %577  ;;  %v569_v1 = vrot.slane %v565_v56, 4  ;;  %v570_v2 = vrot.slane %v566_v57, 4 }
 0x1a7   : > { %v511_v37 = vadd.f32 %v507_v50, %v476_v48  ;;  %v512_v42 = vadd.f32 %v508_v51, %v477_v49 }
 0x1a9   : > { %v580_v60 = vpop.permute.xlu1 %579  ;;  %v540_v61 = vadd.f32 %v538_v53, %v511_v37  ;;  %v541_v62 = vadd.f32 %v539_v54, %v512_v42 }
 0x1aa   : > { %v582_v63 = vsel %vm581_vm8, %v578_v52, %v580_v60  ;;  %v586_v0 = vsel %vm581_vm8, %v580_v60, %v578_v52 }
 0x1ab   : > { %v600_v3 = vmul.f32 %v593_v58, %v582_v63  ;;  %v601_v4 = vmul.f32 %v597_v59, %v586_v0  ;;  %v573_v5 = vadd.f32 %v569_v1, %v540_v61  ;;  %v574_v6 = vadd.f32 %v570_v2, %v541_v62 }
 0x1ad   : > { %v602_v7 = vadd.f32 %v600_v3, %v573_v5  ;;  %v603_v8 = vadd.f32 %v601_v4, %v574_v6 }
 0x1b2   : > { %v608_v35 = vpop.permute.xlu0 %607 }
 0x1b3   : > { %v610_v9 = vadd.f32 %v608_v35, %v602_v7  ;;  %v611_v36 = vadd.f32 %v608_v35, %v603_v8 }
 0x1b5   : > { %v612_v10 = vmax.f32 %v610_v9, 0.0  ;;  %v613_v11 = vmax.f32 %v611_v36, 0.0 }
 0x1b7   : > { %v616_v12 = vcombine.low %v612_v10, %v613_v11 }
 0x1b9   : > { %618 = vst [vmem:[%s215_s30] sm:$0xff] %v616_v12 }
 0x1ba   : > { %847 = shalt.err (!%p844_p2)
}
 0x1bb   : > { %s848_s13 = scalar_lea.hbm %s1143_s9, 128  ;;  %s852_s11 = scalar_lea.hbm %s1191_s4, 256 }
 0x1bc   : > { %p849_p4 = scmp.ne.s32.totalorder %s1143_s9, %s848_s13  ;;  %p853_p9 = scmp.lt.u32.totalorder %s1143_s9, %s1191_s4 }
 0x1bd   : > { %p854_p1 = scmp.lt.u32.totalorder %s852_s11, %s848_s13  ;;  %p856_p6 = scmp.lt.u32.totalorder %s848_s13, %s1143_s9 }
 0x1be   : > { %p850_p5 = pnand %p849_p4, %p1198_p11 }
 0x1bf   : > { %p855_p3 = por %p854_p1, %p853_p9 }
 0x1c0   : > { %p851_p7 = pneg %p850_p5 }
 0x1c1   : > { %p857_p12 = por %p856_p6, %p855_p3 }
 0x1c3   : > { %p858_p13 = pnand %p857_p12, %p851_p7 }
 0x1c5   : > { %861 = shalt.err (!%p858_p13)
}
 0x1c6   : > { %747 = dma.vmem_to_hbm [thread:$0]  (%p1198_p11), %s1145_s5, 128, %s1143_s9, %s620_s14  }
 0x1c7 PF: > { %s646_s25 = sand.u32 1, %s888_s15   ;;  %p1199_p8 = scmp.ne.s32.totalorder %s1196_s28, 0 }
 0x1c8   : > { %p1200_p10 = scmp.ge.s32.totalorder %s900_s18, 2  ;;  %s647_s29 = scalar_lea.sflag [#allocation4], %s646_s25 }
 0x1ca   : > { %p754_p0 = pnand %p1200_p10, %p1199_p8 }
 0x1cc   : > { %883 = dma.done.wait (!%p754_p0), %s647_s29, 128  }
 0x1cd   : > { %885 = vsyncadd (!%p754_p0), %s647_s29, 4294967168  ;;  %p17_p2 = scmp.ge.s32.totalorder %s966_s21, 4   ;;  %s1201_s15 = smov %s892_s16 }
 0x1ce   : > { %s1202_s16 = smov %s896_s17  ;;  %s1203_s17 = smov %s978_s24 }
 0x1cf   : > { %s1204_s18 = smov %s966_s21  ;;  %19 = sbr.rel (!%p17_p2) target bundleno = 5 (0x5), region = 89 }
 0x1d6   :  { %652 = vsyncpa [#allocation3], 1 }
 0x1d7   :  { %654 = vsyncpa [#allocation3 + $0x1], 1 }
 0x1d8   :  { %655 = vsyncpa [#allocation4], 1 }
 0x1d9   :  { %657 = vsyncpa [#allocation4 + $0x1], 1 }

</bundles_post_ra>
